<compile_context>
chip_gen: v5e
topology: v5e:2x2
jax: 0.10.0
libtpu: 0.0.40
codegen_flags: <defaults>
</compile_context>

<pallas_src>
import functools

import jax
import jax.numpy as jnp
from jax.experimental import pallas as pl
from jax.experimental.pallas import tpu as pltpu

LANE = 128
SUBLANE = 8


def _round_up(n, m):
    return ((n + m - 1) // m) * m


# ------------------------------ fused kernel --------------------------------


def _vae_fused_kernel(x_ref, eps_ref, w_stk_ref, b_stk_ref, wfc_ref, bfc_ref,
                      rec_ref, ml_ref, *, n_enc, n_dec, edim):
    """One grid step = one batch tile through the whole VAE forward.

    w_stk_ref: (L, F, F) bf16, L = n_enc + n_dec + 1 (encoder layers, decoder
    layers, final output layer).  b_stk_ref: (L, 1, F) f32.
    wfc_ref: (F, 2*E_pad) merged mu|logvar head.  ml_ref: merged mu|logvar out.
    """
    cdt = w_stk_ref.dtype  # matmul input dtype (bf16); accumulation is f32

    def dense(a, w_full, b):
        k = a.shape[1]
        w = w_full[:k, :] if k < w_full.shape[0] else w_full
        return jnp.dot(a.astype(cdt), w, preferred_element_type=jnp.float32) + b

    # ----- encoder compress stack: Linear + ReLU -----
    h = x_ref[...]                                      # (tm, din) f32, unpadded
    for l in range(n_enc):
        h = jnp.maximum(dense(h, w_stk_ref[l], b_stk_ref[l]), 0.0)

    # ----- merged mu/logvar head + reparameterization (f32 elementwise) -----
    ml = dense(h, wfc_ref[...], bfc_ref[...])           # (tm, 2*E_pad) f32
    ml_ref[...] = ml.astype(ml_ref.dtype)
    e_pad = wfc_ref.shape[1] // 2
    mu = ml[:, :edim]
    logvar = ml[:, e_pad:e_pad + edim]
    emb = eps_ref[...] * jnp.exp(0.5 * logvar) + mu     # (tm, edim) f32

    # ----- decoder decompress stack: Linear + ReLU -----
    d = emb
    for l in range(n_dec):
        d = jnp.maximum(dense(d, w_stk_ref[n_enc + l], b_stk_ref[n_enc + l]), 0.0)

    # ----- final decoder Linear (no activation) -----
    rec = dense(d, w_stk_ref[n_enc + n_dec], b_stk_ref[n_enc + n_dec])
    rec_ref[...] = rec.astype(rec_ref.dtype)


# -------------------------- parameter construction --------------------------


def _init_linear(key, din, dout):
    kw, kb = jax.random.split(key)
    bound = 1.0 / jnp.sqrt(jnp.float32(din))
    w = jax.random.uniform(kw, (din, dout), jnp.float32, -bound, bound)
    b = jax.random.uniform(kb, (dout,), jnp.float32, -bound, bound)
    return w, b


def init_vae_params(key, data_dim, compress_dims, embedding_dim, decompress_dims):
    """Unpadded f32 parameters (torch-Linear-style init), weights stored (in, out)."""
    params = {"enc_seq": [], "dec_seq": []}
    dim = data_dim
    for item in list(compress_dims):
        key, sub = jax.random.split(key)
        params["enc_seq"].append(_init_linear(sub, dim, item))
        dim = item
    key, k1 = jax.random.split(key)
    params["fc1"] = _init_linear(k1, dim, embedding_dim)   # mu head
    key, k2 = jax.random.split(key)
    params["fc2"] = _init_linear(k2, dim, embedding_dim)   # logvar head

    dim = embedding_dim
    for item in list(decompress_dims):
        key, sub = jax.random.split(key)
        params["dec_seq"].append(_init_linear(sub, dim, item))
        dim = item
    key, kout = jax.random.split(key)
    params["dec_out"] = _init_linear(kout, dim, data_dim)
    params["sigma"] = jnp.ones((data_dim,), jnp.float32) * 0.1
    return params


def _pad2(a, rows, cols):
    return jnp.zeros((rows, cols), a.dtype).at[: a.shape[0], : a.shape[1]].set(a)


def prepare_padded_params(params, weight_dtype=jnp.bfloat16):
    """One-time prep: pad every layer to a common lane-dense width F, stack the
    (F,F) weights into one (L,F,F) bf16 tensor (biases (L,1,F) f32), and merge
    the fc1/fc2 heads into a single (F, 2*E_pad) weight."""
    enc, dec = params["enc_seq"], params["dec_seq"]
    (w1, b1), (w2, b2) = params["fc1"], params["fc2"]
    wo, bo = params["dec_out"]

    dims = set()
    for w, _ in enc + dec + [(wo, bo)]:
        dims.update((w.shape[0], w.shape[1]))
    dims.update((w1.shape[0], w1.shape[1]))
    F = max(_round_up(d, LANE) for d in dims)            # common padded width

    ws, bs = [], []
    for w, b in enc + dec + [(wo, bo)]:
        ws.append(_pad2(w, F, F))
        bs.append(_pad2(b.reshape(1, -1), 1, F))
    w_stack = jnp.stack(ws).astype(weight_dtype)         # (L, F, F) bf16
    b_stack = jnp.stack(bs)                              # (L, 1, F) f32

    e_pad = _round_up(w1.shape[1], LANE)                 # padded embedding width
    wfc = jnp.zeros((F, 2 * e_pad), jnp.float32)
    wfc = wfc.at[: w1.shape[0], : w1.shape[1]].set(w1)
    wfc = wfc.at[: w2.shape[0], e_pad: e_pad + w2.shape[1]].set(w2)
    bfc = jnp.zeros((1, 2 * e_pad), jnp.float32)
    bfc = bfc.at[0, : b1.shape[0]].set(b1)
    bfc = bfc.at[0, e_pad: e_pad + b2.shape[0]].set(b2)

    return {
        "w_stack": w_stack,
        "b_stack": b_stack,
        "w_fc": wfc.astype(weight_dtype),
        "b_fc": bfc,
        "sigma": params["sigma"],
    }


# ------------------------------- VAE forward --------------------------------


def vae_forward(pp, x, eps, *, n_enc, n_dec, data_dim, embedding_dim, tm=None):
    """Mirrors VAE.forward: returns (rec, sigmas, mu, logvar). Single pallas_call."""
    B, din = x.shape
    edim = eps.shape[1]
    w_stk, b_stk = pp["w_stack"], pp["b_stack"]
    wfc, bfc = pp["w_fc"], pp["b_fc"]
    L, F, _ = w_stk.shape
    e_pad = wfc.shape[1] // 2

    # Batch tiling: one grid step for small batches; MXU-sized tiles otherwise.
    if tm is None:
        tm = B if B <= 256 else 256
    if tm >= B:
        tm = B
    else:
        tm = min(_round_up(tm, SUBLANE), B)
    grid = (pl.cdiv(B, tm),)

    in_specs = [
        pl.BlockSpec((tm, din), lambda i: (i, 0)),        # x (unpadded)
        pl.BlockSpec((tm, edim), lambda i: (i, 0)),       # eps (unpadded)
        pl.BlockSpec(w_stk.shape, lambda i: (0, 0, 0)),   # resident weight stack
        pl.BlockSpec(b_stk.shape, lambda i: (0, 0, 0)),   # resident bias stack
        pl.BlockSpec(wfc.shape, lambda i: (0, 0)),        # merged mu/logvar head
        pl.BlockSpec(bfc.shape, lambda i: (0, 0)),
    ]
    out_shape = (
        jax.ShapeDtypeStruct((B, F), jnp.float32),          # rec (padded cols)
        jax.ShapeDtypeStruct((B, 2 * e_pad), jnp.float32),  # merged mu|logvar
    )
    out_specs = (
        pl.BlockSpec((tm, F), lambda i: (i, 0)),
        pl.BlockSpec((tm, 2 * e_pad), lambda i: (i, 0)),
    )

    flops = 2 * B * (L * F * F + F * 2 * e_pad)
    bytes_accessed = sum(a.size * a.dtype.itemsize
                         for a in (x, eps, w_stk, b_stk, wfc, bfc))
    bytes_accessed += B * (F + 2 * e_pad) * 4
    cost = pl.CostEstimate(flops=flops, transcendentals=B * edim,
                           bytes_accessed=bytes_accessed)

    kernel = functools.partial(_vae_fused_kernel, n_enc=n_enc, n_dec=n_dec, edim=edim)
    rec_p, ml_p = pl.pallas_call(
        kernel,
        out_shape=out_shape,
        grid=grid,
        in_specs=in_specs,
        out_specs=out_specs,
        compiler_params=pltpu.CompilerParams(
            dimension_semantics=("parallel",) if grid[0] > 1 else ("arbitrary",)),
        cost_estimate=cost,
    )(x, eps, w_stk, b_stk, wfc, bfc)

    rec = rec_p[:, :data_dim]
    mu = ml_p[:, :embedding_dim]
    logvar = ml_p[:, e_pad:e_pad + embedding_dim]
    return rec, pp["sigma"], mu, logvar


def vae_forward_ref(params, x, eps):
    """Pure-JAX f32 reference (unpadded params) for correctness checking."""
    h = x
    for (w, b) in params["enc_seq"]:
        h = jnp.maximum(h @ w + b, 0.0)
    mu = h @ params["fc1"][0] + params["fc1"][1]
    logvar = h @ params["fc2"][0] + params["fc2"][1]
    std = jnp.exp(0.5 * logvar)
    emb = eps * std + mu
    d = emb
    for (w, b) in params["dec_seq"]:
        d = jnp.maximum(d @ w + b, 0.0)
    rec = d @ params["dec_out"][0] + params["dec_out"][1]
    return rec, params["sigma"], mu, logvar


# ----------------------------------- main ------------------------------------

if __name__ == "__main__":
    batch = 64
    data_dim = 32
    compress_dims = (64, 32)
    embedding_dim = 16
    decompress_dims = (32, 64)

    key = jax.random.PRNGKey(0)
    kp, kx, ke = jax.random.split(key, 3)

    params = init_vae_params(kp, data_dim, compress_dims, embedding_dim, decompress_dims)
    padded = prepare_padded_params(params)   # pad/merge/stack hoisted out of forward

    x = jax.random.normal(kx, (batch, data_dim), jnp.float32)
    # eps ~ N(0, 1), matching torch.randn_like(std) (RNG stream differs, semantics identical)
    eps = jax.random.normal(ke, (batch, embedding_dim), jnp.float32)

    # tm defaults to the full batch -> grid=(1,), no per-step overhead at this size.
    fwd = jax.jit(functools.partial(
        vae_forward,
        n_enc=len(compress_dims), n_dec=len(decompress_dims),
        data_dim=data_dim, embedding_dim=embedding_dim))
    rec, sigmas, mu, logvar = jax.block_until_ready(fwd(padded, x, eps))

    rec_r, sig_r, mu_r, lv_r = vae_forward_ref(params, x, eps)
    assert rec.shape == (batch, data_dim) and sigmas.shape == (data_dim,)
    assert mu.shape == (batch, embedding_dim) and logvar.shape == (batch, embedding_dim)
    # bf16 weights / bf16 matmul inputs (f32 accumulation) -> loosened tolerance.
    assert jnp.allclose(rec, rec_r, atol=5e-2, rtol=5e-2)
    assert jnp.allclose(mu, mu_r, atol=5e-2, rtol=5e-2)
    assert jnp.allclose(logvar, lv_r, atol=5e-2, rtol=5e-2)
    assert jnp.allclose(sigmas, sig_r)
    assert bool(jnp.isfinite(rec).all() & jnp.isfinite(mu).all() & jnp.isfinite(logvar).all())

    print("KERNEL_OK")
</pallas_src>

<mosaic_0001>
module attributes {stable_mosaic.version = 11 : i64} {
  func.func @_vae_fused_kernel(%arg0: i32, %arg1: memref<64x32xf32, #tpu.memory_space<vmem>>, %arg2: memref<64x16xf32, #tpu.memory_space<vmem>>, %arg3: memref<5x128x128xbf16, #tpu.memory_space<vmem>>, %arg4: memref<5x1x128xf32, #tpu.memory_space<vmem>>, %arg5: memref<128x256xbf16, #tpu.memory_space<vmem>>, %arg6: memref<1x256xf32, #tpu.memory_space<vmem>>, %arg7: memref<64x128xf32, #tpu.memory_space<vmem>>, %arg8: memref<64x256xf32, #tpu.memory_space<vmem>>) attributes {dimension_semantics = [#tpu.dimension_semantics<arbitrary>], iteration_bounds = array<i64: 1>, scalar_prefetch = 0 : i64, scratch_operands = 0 : i64, tpu.core_type = #tpu.core_type<tc>, window_params = [{transform_indices = @transform_0, window_bounds = array<i64: 64, 32>}, {transform_indices = @transform_1, window_bounds = array<i64: 64, 16>}, {pipeline_mode = #tpu.pipeline_mode<synchronous>, transform_indices = @transform_2, window_bounds = array<i64: 5, 128, 128>}, {pipeline_mode = #tpu.pipeline_mode<synchronous>, transform_indices = @transform_3, window_bounds = array<i64: 5, 1, 128>}, {pipeline_mode = #tpu.pipeline_mode<synchronous>, transform_indices = @transform_4, window_bounds = array<i64: 128, 256>}, {pipeline_mode = #tpu.pipeline_mode<synchronous>, transform_indices = @transform_5, window_bounds = array<i64: 1, 256>}, {transform_indices = @transform_6, window_bounds = array<i64: 64, 128>}, {transform_indices = @transform_7, window_bounds = array<i64: 64, 256>}]} {
    %c0 = arith.constant 0 : index
    %c0_0 = arith.constant 0 : index
    %0 = vector.load %arg1[%c0, %c0_0] : memref<64x32xf32, #tpu.memory_space<vmem>>, vector<64x32xf32>
    %c0_1 = arith.constant 0 : index
    %c0_2 = arith.constant 0 : index
    %c0_3 = arith.constant 0 : index
    %1 = vector.load %arg3[%c0_1, %c0_2, %c0_3] : memref<5x128x128xbf16, #tpu.memory_space<vmem>>, vector<1x128x128xbf16>
    %2 = vector.shape_cast %1 : vector<1x128x128xbf16> to vector<128x128xbf16>
    %c0_4 = arith.constant 0 : index
    %c0_5 = arith.constant 0 : index
    %c0_6 = arith.constant 0 : index
    %3 = vector.load %arg4[%c0_4, %c0_5, %c0_6] : memref<5x1x128xf32, #tpu.memory_space<vmem>>, vector<1x1x128xf32>
    %4 = vector.shape_cast %3 : vector<1x1x128xf32> to vector<1x128xf32>
    %5 = vector.extract_strided_slice %2 {offsets = [0, 0], sizes = [32, 128], strides = [1, 1]} : vector<128x128xbf16> to vector<32x128xbf16>
    %6 = arith.truncf %0 : vector<64x32xf32> to vector<64x32xbf16>
    %cst = arith.constant dense<0.000000e+00> : vector<64x128xf32>
    %7 = tpu.matmul %6, %5, %cst {dimension_numbers = #tpu.dot_dimension_numbers<[1], [0], [0], [1], [0, 0, 1, 1], [], []>} : vector<64x32xbf16>, vector<32x128xbf16>, vector<64x128xf32> -> vector<64x128xf32>
    %8 = vector.broadcast %4 : vector<1x128xf32> to vector<64x128xf32>
    %9 = arith.addf %7, %8 : vector<64x128xf32>
    %cst_7 = arith.constant 0.000000e+00 : f32
    %10 = vector.broadcast %cst_7 : f32 to vector<64x128xf32>
    %11 = arith.maximumf %9, %10 : vector<64x128xf32>
    %c1 = arith.constant 1 : index
    %c0_8 = arith.constant 0 : index
    %c0_9 = arith.constant 0 : index
    %12 = vector.load %arg3[%c1, %c0_8, %c0_9] : memref<5x128x128xbf16, #tpu.memory_space<vmem>>, vector<1x128x128xbf16>
    %13 = vector.shape_cast %12 : vector<1x128x128xbf16> to vector<128x128xbf16>
    %c1_10 = arith.constant 1 : index
    %c0_11 = arith.constant 0 : index
    %c0_12 = arith.constant 0 : index
    %14 = vector.load %arg4[%c1_10, %c0_11, %c0_12] : memref<5x1x128xf32, #tpu.memory_space<vmem>>, vector<1x1x128xf32>
    %15 = vector.shape_cast %14 : vector<1x1x128xf32> to vector<1x128xf32>
    %16 = arith.truncf %11 : vector<64x128xf32> to vector<64x128xbf16>
    %cst_13 = arith.constant dense<0.000000e+00> : vector<64x128xf32>
    %17 = tpu.matmul %16, %13, %cst_13 {dimension_numbers = #tpu.dot_dimension_numbers<[1], [0], [0], [1], [0, 0, 1, 1], [], []>} : vector<64x128xbf16>, vector<128x128xbf16>, vector<64x128xf32> -> vector<64x128xf32>
    %18 = vector.broadcast %15 : vector<1x128xf32> to vector<64x128xf32>
    %19 = arith.addf %17, %18 : vector<64x128xf32>
    %cst_14 = arith.constant 0.000000e+00 : f32
    %20 = vector.broadcast %cst_14 : f32 to vector<64x128xf32>
    %21 = arith.maximumf %19, %20 : vector<64x128xf32>
    %c0_15 = arith.constant 0 : index
    %c0_16 = arith.constant 0 : index
    %22 = vector.load %arg5[%c0_15, %c0_16] : memref<128x256xbf16, #tpu.memory_space<vmem>>, vector<128x256xbf16>
    %c0_17 = arith.constant 0 : index
    %c0_18 = arith.constant 0 : index
    %23 = vector.load %arg6[%c0_17, %c0_18] : memref<1x256xf32, #tpu.memory_space<vmem>>, vector<1x256xf32>
    %24 = arith.truncf %21 : vector<64x128xf32> to vector<64x128xbf16>
    %cst_19 = arith.constant dense<0.000000e+00> : vector<64x256xf32>
    %25 = tpu.matmul %24, %22, %cst_19 {dimension_numbers = #tpu.dot_dimension_numbers<[1], [0], [0], [1], [0, 0, 1, 1], [], []>} : vector<64x128xbf16>, vector<128x256xbf16>, vector<64x256xf32> -> vector<64x256xf32>
    %26 = vector.broadcast %23 : vector<1x256xf32> to vector<64x256xf32>
    %27 = arith.addf %25, %26 : vector<64x256xf32>
    %c0_20 = arith.constant 0 : index
    %c0_21 = arith.constant 0 : index
    %28 = vector.load %arg8[%c0_20, %c0_21] : memref<64x256xf32, #tpu.memory_space<vmem>>, vector<64x256xf32>
    tpu.vector_store %arg8[%c0_20, %c0_21], %27 {strides = array<i32>} : memref<64x256xf32, #tpu.memory_space<vmem>>, vector<64x256xf32>,
    %29 = vector.extract_strided_slice %27 {offsets = [0, 0], sizes = [64, 16], strides = [1, 1]} : vector<64x256xf32> to vector<64x16xf32>
    %30 = vector.extract_strided_slice %27 {offsets = [0, 128], sizes = [64, 16], strides = [1, 1]} : vector<64x256xf32> to vector<64x16xf32>
    %c0_22 = arith.constant 0 : index
    %c0_23 = arith.constant 0 : index
    %31 = vector.load %arg2[%c0_22, %c0_23] : memref<64x16xf32, #tpu.memory_space<vmem>>, vector<64x16xf32>
    %cst_24 = arith.constant 5.000000e-01 : f32
    %32 = vector.broadcast %cst_24 : f32 to vector<64x16xf32>
    %33 = arith.mulf %32, %30 : vector<64x16xf32>
    %34 = math.exp %33 : vector<64x16xf32>
    %35 = arith.mulf %31, %34 : vector<64x16xf32>
    %36 = arith.addf %35, %29 : vector<64x16xf32>
    %c2 = arith.constant 2 : index
    %c0_25 = arith.constant 0 : index
    %c0_26 = arith.constant 0 : index
    %37 = vector.load %arg3[%c2, %c0_25, %c0_26] : memref<5x128x128xbf16, #tpu.memory_space<vmem>>, vector<1x128x128xbf16>
    %38 = vector.shape_cast %37 : vector<1x128x128xbf16> to vector<128x128xbf16>
    %c2_27 = arith.constant 2 : index
    %c0_28 = arith.constant 0 : index
    %c0_29 = arith.constant 0 : index
    %39 = vector.load %arg4[%c2_27, %c0_28, %c0_29] : memref<5x1x128xf32, #tpu.memory_space<vmem>>, vector<1x1x128xf32>
    %40 = vector.shape_cast %39 : vector<1x1x128xf32> to vector<1x128xf32>
    %41 = vector.extract_strided_slice %38 {offsets = [0, 0], sizes = [16, 128], strides = [1, 1]} : vector<128x128xbf16> to vector<16x128xbf16>
    %42 = arith.truncf %36 : vector<64x16xf32> to vector<64x16xbf16>
    %cst_30 = arith.constant dense<0.000000e+00> : vector<64x128xf32>
    %43 = tpu.matmul %42, %41, %cst_30 {dimension_numbers = #tpu.dot_dimension_numbers<[1], [0], [0], [1], [0, 0, 1, 1], [], []>} : vector<64x16xbf16>, vector<16x128xbf16>, vector<64x128xf32> -> vector<64x128xf32>
    %44 = vector.broadcast %40 : vector<1x128xf32> to vector<64x128xf32>
    %45 = arith.addf %43, %44 : vector<64x128xf32>
    %cst_31 = arith.constant 0.000000e+00 : f32
    %46 = vector.broadcast %cst_31 : f32 to vector<64x128xf32>
    %47 = arith.maximumf %45, %46 : vector<64x128xf32>
    %c3 = arith.constant 3 : index
    %c0_32 = arith.constant 0 : index
    %c0_33 = arith.constant 0 : index
    %48 = vector.load %arg3[%c3, %c0_32, %c0_33] : memref<5x128x128xbf16, #tpu.memory_space<vmem>>, vector<1x128x128xbf16>
    %49 = vector.shape_cast %48 : vector<1x128x128xbf16> to vector<128x128xbf16>
    %c3_34 = arith.constant 3 : index
    %c0_35 = arith.constant 0 : index
    %c0_36 = arith.constant 0 : index
    %50 = vector.load %arg4[%c3_34, %c0_35, %c0_36] : memref<5x1x128xf32, #tpu.memory_space<vmem>>, vector<1x1x128xf32>
    %51 = vector.shape_cast %50 : vector<1x1x128xf32> to vector<1x128xf32>
    %52 = arith.truncf %47 : vector<64x128xf32> to vector<64x128xbf16>
    %cst_37 = arith.constant dense<0.000000e+00> : vector<64x128xf32>
    %53 = tpu.matmul %52, %49, %cst_37 {dimension_numbers = #tpu.dot_dimension_numbers<[1], [0], [0], [1], [0, 0, 1, 1], [], []>} : vector<64x128xbf16>, vector<128x128xbf16>, vector<64x128xf32> -> vector<64x128xf32>
    %54 = vector.broadcast %51 : vector<1x128xf32> to vector<64x128xf32>
    %55 = arith.addf %53, %54 : vector<64x128xf32>
    %cst_38 = arith.constant 0.000000e+00 : f32
    %56 = vector.broadcast %cst_38 : f32 to vector<64x128xf32>
    %57 = arith.maximumf %55, %56 : vector<64x128xf32>
    %c4 = arith.constant 4 : index
    %c0_39 = arith.constant 0 : index
    %c0_40 = arith.constant 0 : index
    %58 = vector.load %arg3[%c4, %c0_39, %c0_40] : memref<5x128x128xbf16, #tpu.memory_space<vmem>>, vector<1x128x128xbf16>
    %59 = vector.shape_cast %58 : vector<1x128x128xbf16> to vector<128x128xbf16>
    %c4_41 = arith.constant 4 : index
    %c0_42 = arith.constant 0 : index
    %c0_43 = arith.constant 0 : index
    %60 = vector.load %arg4[%c4_41, %c0_42, %c0_43] : memref<5x1x128xf32, #tpu.memory_space<vmem>>, vector<1x1x128xf32>
    %61 = vector.shape_cast %60 : vector<1x1x128xf32> to vector<1x128xf32>
    %62 = arith.truncf %57 : vector<64x128xf32> to vector<64x128xbf16>
    %cst_44 = arith.constant dense<0.000000e+00> : vector<64x128xf32>
    %63 = tpu.matmul %62, %59, %cst_44 {dimension_numbers = #tpu.dot_dimension_numbers<[1], [0], [0], [1], [0, 0, 1, 1], [], []>} : vector<64x128xbf16>, vector<128x128xbf16>, vector<64x128xf32> -> vector<64x128xf32>
    %64 = vector.broadcast %61 : vector<1x128xf32> to vector<64x128xf32>
    %65 = arith.addf %63, %64 : vector<64x128xf32>
    %c0_45 = arith.constant 0 : index
    %c0_46 = arith.constant 0 : index
    %66 = vector.load %arg7[%c0_45, %c0_46] : memref<64x128xf32, #tpu.memory_space<vmem>>, vector<64x128xf32>
    tpu.vector_store %arg7[%c0_45, %c0_46], %65 {strides = array<i32>} : memref<64x128xf32, #tpu.memory_space<vmem>>, vector<64x128xf32>,
    return
  }
  func.func @transform_0(%arg0: i32) -> (i32, i32) {
    %c0_i32 = arith.constant 0 : i32
    %c0_i32_0 = arith.constant 0 : i32
    return %arg0, %c0_i32 : i32, i32
  }
  func.func @transform_1(%arg0: i32) -> (i32, i32) {
    %c0_i32 = arith.constant 0 : i32
    %c0_i32_0 = arith.constant 0 : i32
    return %arg0, %c0_i32 : i32, i32
  }
  func.func @transform_2(%arg0: i32) -> (i32, i32, i32) {
    %c0_i32 = arith.constant 0 : i32
    %c0_i32_0 = arith.constant 0 : i32
    %c0_i32_1 = arith.constant 0 : i32
    %c0_i32_2 = arith.constant 0 : i32
    return %c0_i32, %c0_i32_0, %c0_i32_1 : i32, i32, i32
  }
  func.func @transform_3(%arg0: i32) -> (i32, i32, i32) {
    %c0_i32 = arith.constant 0 : i32
    %c0_i32_0 = arith.constant 0 : i32
    %c0_i32_1 = arith.constant 0 : i32
    %c0_i32_2 = arith.constant 0 : i32
    return %c0_i32, %c0_i32_0, %c0_i32_1 : i32, i32, i32
  }
  func.func @transform_4(%arg0: i32) -> (i32, i32) {
    %c0_i32 = arith.constant 0 : i32
    %c0_i32_0 = arith.constant 0 : i32
    %c0_i32_1 = arith.constant 0 : i32
    return %c0_i32, %c0_i32_0 : i32, i32
  }
  func.func @transform_5(%arg0: i32) -> (i32, i32) {
    %c0_i32 = arith.constant 0 : i32
    %c0_i32_0 = arith.constant 0 : i32
    %c0_i32_1 = arith.constant 0 : i32
    return %c0_i32, %c0_i32_0 : i32, i32
  }
  func.func @transform_6(%arg0: i32) -> (i32, i32) {
    %c0_i32 = arith.constant 0 : i32
    %c0_i32_0 = arith.constant 0 : i32
    return %arg0, %c0_i32 : i32, i32
  }
  func.func @transform_7(%arg0: i32) -> (i32, i32) {
    %c0_i32 = arith.constant 0 : i32
    %c0_i32_0 = arith.constant 0 : i32
    return %arg0, %c0_i32 : i32, i32
  }
}

</mosaic_0001>

<bundles_post_ra>
// kernel: vae_forward.1
= control target key start
LH: loop header
LB: loop body
LE: loop exit
PB: predicated region body
PF: predicated region fallthrough
CT: control target
= control target key end

     0   :  { %13 = vsyncpa [#allocation3], 0  ;;  %s1055_s27 = smov [#allocation2]   ;;  %s1056_s29 = smov 64   ;;  %s1363_s0 = inlined_call_operand.vmem [shape: f32[64,32], index: 0, kind: input, shape index: {}]   ;;  %s1364_s1 = inlined_call_operand.vmem [shape: f32[64,16], index: 1, kind: input, shape index: {}]   ;;  %s1365_s2 = inlined_call_operand.hbm [shape: bf16[5,128,128], index: 2, kind: input, shape index: {}]   ;;  %s1366_s3 = inlined_call_operand.vmem [shape: f32[5,1,128], index: 3, kind: input, shape index: {}]   ;;  %s1367_s4 = inlined_call_operand.vmem [shape: bf16[128,256], index: 4, kind: input, shape index: {}]   ;;  %s1368_s5 = inlined_call_operand.vmem [shape: f32[1,256], index: 5, kind: input, shape index: {}]   ;;  %s1369_s6 = inlined_call_operand.vmem [shape: f32[64,128], index: 6, kind: output, shape index: {0}]   ;;  %s1370_s7 = inlined_call_operand.vmem [shape: f32[64,256], index: 7, kind: output, shape index: {1}]  }
   0x1   :  { %s22_s26 = sshll.u32 %s1365_s2, 4  ;;  %s24_s28 = sshll.u32 %s1055_s27, 4  ;;  %s23_s26 = int_to_ptr.hbm [resolvable:$true] %s22_s26  ;;  %s25_s28 = int_to_ptr.vmem [resolvable:$true] %s24_s28 }
   0x2   :  { %s1057_s30 = smov 4  }
   0x3   :  { %30 = dma.hbm_to_vmem [thread:$0]  %s23_s26, 5120, %s25_s28, [#allocation3], %s1056_s29, %s1056_s29, %s1057_s30  }
   0x4   :  { %1053 = dma.done.wait [#allocation3], 5120  }
   0x5   :  { %1054 = vsyncadd [#allocation3], 4294962176  ;;  %v947_v0 = vld [vmem:[#allocation2 + $0x8] sm:$0xff]  ;;  %v946_v1 = vld [vmem:[#allocation2] sm:$0xff]  ;;  %vm74_vm0 = vcmask 261120   ;;  %vm481_vm1 = vcmask 130048  }
   0x6   :  { %93 = vmatpush.bf16.msra.mxu0 %v947_v0  ;;  %v42_v2 = vld [vmem:[%s1363_s0] sm:$0xff]  ;;  %v43_v3 = vld [vmem:[%s1363_s0 + $0x8] sm:$0xff]  ;;  %v44_v5 = vld [vmem:[%s1363_s0 + $0x10] sm:$0xff] }
   0x7   :  { %v55_v4 = vpack.c.bf16 %v43_v3, %v42_v2  ;;  %v45_v6 = vld [vmem:[%s1363_s0 + $0x18] sm:$0xff]  ;;  %v954_v9 = vld [vmem:[#allocation2 + $0x70] sm:$0xff]  ;;  %v953_v10 = vld [vmem:[#allocation2 + $0x68] sm:$0xff] }
   0x8   :  { %v56_v7 = vpack.c.bf16 %v45_v6, %v44_v5  ;;  %v955_v8 = vld [vmem:[#allocation2 + $0x78] sm:$0xff]  ;;  %v46_v11 = vld [vmem:[%s1363_s0 + $0x20] sm:$0xff]  ;;  %v47_v12 = vld [vmem:[%s1363_s0 + $0x28] sm:$0xff] }
   0x9   :  { %198 = vmatpush.bf16.msra.mxu1 %v955_v8  ;;  %989 = vmatpush.bf16.msra.mxu3 %v955_v8  ;;  %v952_v13 = vld [vmem:[#allocation2 + $0x60] sm:$0xff]  ;;  %v57_v14 = vpack.c.bf16 %v47_v12, %v46_v11  ;;  %v48_v15 = vld [vmem:[%s1363_s0 + $0x30] sm:$0xff]  ;;  %v49_v16 = vld [vmem:[%s1363_s0 + $0x38] sm:$0xff] }
   0xa   :  { %94 = vmatpush.bf16.msra.mxu0 %v946_v1  ;;  %v58_v17 = vpack.c.bf16 %v49_v16, %v48_v15  ;;  %v951_v18 = vld [vmem:[#allocation2 + $0x58] sm:$0xff]  ;;  %v950_v19 = vld [vmem:[#allocation2 + $0x50] sm:$0xff]  ;;  %v949_v20 = vld [vmem:[#allocation2 + $0x48] sm:$0xff] }
   0xb   :  { %v948_v21 = vld [vmem:[#allocation2 + $0x40] sm:$0xff]  ;;  %v865_v37 = vld [vmem:[%s1367_s4 + $0x70] sm:$0xf]  ;;  %v971_v38 = vld [vmem:[%s1367_s4 + $0x74] sm:$0xf0] }
   0xc   :  { %v1008_v23 = vld [vmem:[%s1366_s3] ss:$0 sm:$0xff]  ;;  %v970_v39 = vld [vmem:[%s1367_s4 + $0x74] sm:$0xf]  ;;  %v866_v41 = vor.u32 %v971_v38, %v865_v37  ;;  %v867_v42 = vld [vmem:[%s1367_s4 + $0x78] sm:$0xf0] }
   0xd   :  { %770 = vmatmul.msk.bf16.vlgmr.msra.gmra.mxu0 %vm74_vm0, %v55_v4  ;;  %199 = vmatpush.bf16.msra.mxu1 %v954_v9  ;;  %v857_v43 = vld [vmem:[%s1367_s4 + $0x60] sm:$0xf]  ;;  %v969_v44 = vld [vmem:[%s1367_s4 + $0x64] sm:$0xf0]  ;;  %v870_v45 = vor.u32 %v970_v39, %v867_v42  ;;  %v968_v46 = vld [vmem:[%s1367_s4 + $0x64] sm:$0xf] }
   0xe   :  { %990 = vmatpush.bf16.msra.mxu3 %v954_v9  ;;  %v859_v47 = vld [vmem:[%s1367_s4 + $0x68] sm:$0xf0]  ;;  %341 = vmatpush.bf16.msra.mxu2 %v866_v41  ;;  %v858_v48 = vor.u32 %v969_v44, %v857_v43  ;;  %v849_v50 = vld [vmem:[%s1367_s4 + $0x50] sm:$0xf]  ;;  %v967_v51 = vld [vmem:[%s1367_s4 + $0x54] sm:$0xf0] }
   0xf   :  { %v862_v49 = vor.u32 %v968_v46, %v859_v47  ;;  %v966_v52 = vld [vmem:[%s1367_s4 + $0x54] sm:$0xf]  ;;  %v851_v53 = vld [vmem:[%s1367_s4 + $0x58] sm:$0xf0]  ;;  %v850_v54 = vor.u32 %v967_v51, %v849_v50  ;;  %v841_v57 = vld [vmem:[%s1367_s4 + $0x40] sm:$0xf] }
  0x10   :  { %v854_v56 = vor.u32 %v966_v52, %v851_v53  ;;  %v965_v58 = vld [vmem:[%s1367_s4 + $0x44] sm:$0xf0]  ;;  %v964_v61 = vld [vmem:[%s1367_s4 + $0x44] sm:$0xf]  ;;  %v843_v62 = vld [vmem:[%s1367_s4 + $0x48] sm:$0xf0] }
  0x11   :  { %200 = vmatpush.bf16.msra.mxu1 %v953_v10  ;;  %v842_v63 = vor.u32 %v965_v58, %v841_v57  ;;  %v846_v2 = vor.u32 %v964_v61, %v843_v62  ;;  %v833_v11 = vld [vmem:[%s1367_s4 + $0x30] sm:$0xf]  ;;  %v963_v12 = vld [vmem:[%s1367_s4 + $0x34] sm:$0xf0]  ;;  %v835_v15 = vld [vmem:[%s1367_s4 + $0x38] sm:$0xf0] }
  0x12   :  { %991 = vmatpush.bf16.msra.mxu3 %v953_v10  ;;  %342 = vmatpush.bf16.msra.mxu2 %v858_v48  ;;  %v972_v50 = vld [vmem:[#allocation2 + $0x80] sm:$0xff] }
  0x13   :  { %501 = vmatpush.bf16.msrb.mxu0 %v972_v50 }
  0x15   :  { %201 = vmatpush.bf16.msra.mxu1 %v952_v13 }
  0x16   :  { %992 = vmatpush.bf16.msra.mxu3 %v952_v13  ;;  %343 = vmatpush.bf16.msra.mxu2 %v850_v54  ;;  %v962_v13 = vld [vmem:[%s1367_s4 + $0x34] sm:$0xf] }
  0x17   :  { %v838_v16 = vor.u32 %v962_v13, %v835_v15 }
  0x19   :  { %202 = vmatpush.bf16.msra.mxu1 %v951_v18 }
  0x1a   :  { %993 = vmatpush.bf16.msra.mxu3 %v951_v18  ;;  %344 = vmatpush.bf16.msra.mxu2 %v842_v63  ;;  %v961_v18 = vld [vmem:[%s1367_s4 + $0x24] sm:$0xf0] }
  0x1d   :  { %771 = vmatmul.msk.bf16.gmra.mxu0 %vm74_vm0, %v56_v7  ;;  %203 = vmatpush.bf16.msra.mxu1 %v950_v19 }
  0x1e   :  { %994 = vmatpush.bf16.msra.mxu3 %v950_v19  ;;  %v960_v19 = vld [vmem:[%s1367_s4 + $0x24] sm:$0xf] }
  0x21   :  { %204 = vmatpush.bf16.msra.mxu1 %v949_v20 }
  0x22   :  { %995 = vmatpush.bf16.msra.mxu3 %v949_v20 }
  0x25   :  { %205 = vmatpush.bf16.msra.mxu1 %v948_v21 }
  0x26   :  { %996 = vmatpush.bf16.msra.mxu3 %v948_v21  ;;  %v827_v21 = vld [vmem:[%s1367_s4 + $0x28] sm:$0xf0] }
  0x2a   :  { %370 = vmatpush.bf16.msrb.mxu3 %v870_v45 }
  0x2d   :  { %772 = vmatmul.msk.bf16.gmra.mxu0 %vm74_vm0, %v57_v14  ;;  %v834_v14 = vor.u32 %v963_v12, %v833_v11 }
  0x2e   :  { %371 = vmatpush.bf16.msrb.mxu3 %v862_v49 }
  0x2f   :  { %345 = vmatpush.bf16.msra.mxu2 %v834_v14 }
  0x32   :  { %372 = vmatpush.bf16.msrb.mxu3 %v854_v56 }
  0x36   :  { %373 = vmatpush.bf16.msrb.mxu3 %v846_v2 }
  0x3a   :  { %374 = vmatpush.bf16.msrb.mxu3 %v838_v16 }
  0x3d   :  { %773 = vmatmul.msk.bf16.gmra.mxu0 %vm74_vm0, %v58_v17  ;;  %v825_v17 = vld [vmem:[%s1367_s4 + $0x20] sm:$0xf] }
  0x3e   :  { %v826_v20 = vor.u32 %v961_v18, %v825_v17 }
  0x40   :  { %346 = vmatpush.bf16.msra.mxu2 %v826_v20 }
  0x8a   :  { %v96_v22 = vpop.f32.mrf.mxu0 }
  0x8b   :  { %v97_v24 = vadd.f32 %v1008_v23, %v96_v22  ;;  %v830_v22 = vor.u32 %v960_v19, %v827_v21  ;;  %v415_v19 = vld [vmem:[%s1364_s1] sm:$0xff] }
  0x8d   :  { %v116_v27 = vmax.f32 %v97_v24, 0.0  ;;  %375 = vmatpush.bf16.msrb.mxu3 %v830_v22  ;;  %v959_v24 = vld [vmem:[%s1367_s4 + $0x14] sm:$0xf0]  ;;  %v416_v22 = vld [vmem:[%s1364_s1 + $0x8] sm:$0xff] }
  0x92   :  { %v98_v25 = vpop.f32.mrf.mxu0 }
  0x93   :  { %v99_v26 = vadd.f32 %v1008_v23, %v98_v25  ;;  %v958_v25 = vld [vmem:[%s1367_s4 + $0x14] sm:$0xf] }
  0x95   :  { %v117_v28 = vmax.f32 %v99_v26, 0.0 }
  0x97   :  { %v143_v29 = vpack.c.bf16 %v117_v28, %v116_v27  ;;  %v819_v27 = vld [vmem:[%s1367_s4 + $0x18] sm:$0xf0] }
  0x98   :  { %v822_v28 = vor.u32 %v958_v25, %v819_v27 }
  0x99   :  { %206 = vmatmul.bf16.vlgmr.msra.gmra.mxu1 %v143_v29  ;;  %v809_v29 = vld [vmem:[%s1367_s4] sm:$0xf] }
  0x9a   :  { %v101_v30 = vpop.f32.mrf.mxu0  ;;  %376 = vmatpush.bf16.msrb.mxu3 %v822_v28 }
  0x9b   :  { %v102_v31 = vadd.f32 %v1008_v23, %v101_v30  ;;  %v957_v30 = vld [vmem:[%s1367_s4 + $0x4] sm:$0xf0] }
  0x9d   :  { %v118_v34 = vmax.f32 %v102_v31, 0.0  ;;  %v956_v31 = vld [vmem:[%s1367_s4 + $0x4] sm:$0xf] }
  0xa2   :  { %v103_v32 = vpop.f32.mrf.mxu0 }
  0xa3   :  { %v104_v33 = vadd.f32 %v1008_v23, %v103_v32  ;;  %v810_v32 = vor.u32 %v957_v30, %v809_v29 }
  0xa5   :  { %v119_v35 = vmax.f32 %v104_v33, 0.0  ;;  %v811_v33 = vld [vmem:[%s1367_s4 + $0x8] sm:$0xf0] }
  0xa7   :  { %v144_v36 = vpack.c.bf16 %v119_v35, %v118_v34  ;;  %v814_v34 = vor.u32 %v956_v31, %v811_v33 }
  0xa9   :  { %211 = vmatmul.bf16.gmra.mxu1 %v144_v36  ;;  %377 = vmatpush.bf16.msrb.mxu3 %v814_v34  ;;  %v1009_v36 = vld [vmem:[%s1366_s3 + $0x1] ss:$0 sm:$0xff] }
  0xaa   :  { %v106_v40 = vpop.f32.mrf.mxu0 }
  0xab   :  { %v107_v55 = vadd.f32 %v1008_v23, %v106_v40 }
  0xad   :  { %v120_v0 = vmax.f32 %v107_v55, 0.0 }
  0xb2   :  { %v108_v59 = vpop.f32.mrf.mxu0 }
  0xb3   :  { %v109_v60 = vadd.f32 %v1008_v23, %v108_v59 }
  0xb5   :  { %v121_v1 = vmax.f32 %v109_v60, 0.0 }
  0xb7   :  { %v145_v3 = vpack.c.bf16 %v121_v1, %v120_v0  ;;  %v251_v1 = vld [vmem:[%s1368_s5] sm:$0x3] }
  0xb8   :  { %v1234_v2 = vperm.slane %v251_v1, 0 }
  0xb9   :  { %216 = vmatmul.bf16.vlgmr.msra.gmra.mxu3 %v145_v3  ;;  %v1236_v3 = vperm.slane %v251_v1, 1  ;;  %v419_v1 = vld [vmem:[%s1364_s1 + $0x20] sm:$0xff] }
  0xba   :  { %v111_v4 = vpop.f32.mrf.mxu0 }
  0xbb   :  { %v112_v5 = vadd.f32 %v1008_v23, %v111_v4 }
  0xbd   :  { %v122_v8 = vmax.f32 %v112_v5, 0.0 }
  0xc2   :  { %v113_v6 = vpop.f32.mrf.mxu0 }
  0xc3   :  { %v114_v7 = vadd.f32 %v1008_v23, %v113_v6  ;;  %v817_v23 = vld [vmem:[%s1367_s4 + $0x10] sm:$0xf] }
  0xc4   :  { %v818_v26 = vor.u32 %v959_v24, %v817_v23 }
  0xc5   :  { %v123_v9 = vmax.f32 %v114_v7, 0.0 }
  0xc6   :  { %347 = vmatpush.bf16.msra.mxu2 %v818_v26 }
  0xc7   :  { %v146_v10 = vpack.c.bf16 %v123_v9, %v122_v8 }
  0xc9   :  { %221 = vmatmul.bf16.gmra.mxu3 %v146_v10 }
  0xca   :  { %348 = vmatpush.bf16.msra.mxu2 %v810_v32 }
 0x116   :  { %v207_v35 = vpop.f32.mrf.mxu1 }
 0x117   :  { %v208_v37 = vadd.f32 %v1009_v36, %v207_v35 }
 0x119   :  { %v227_v40 = vmax.f32 %v208_v37, 0.0 }
 0x11e   :  { %v209_v38 = vpop.f32.mrf.mxu1 }
 0x11f   :  { %v210_v39 = vadd.f32 %v1009_v36, %v209_v38  ;;  %v417_v38 = vld [vmem:[%s1364_s1 + $0x10] sm:$0xff] }
 0x121   :  { %v228_v41 = vmax.f32 %v210_v39, 0.0  ;;  %v418_v39 = vld [vmem:[%s1364_s1 + $0x18] sm:$0xff] }
 0x123   :  { %v252_v42 = vpack.c.bf16 %v228_v41, %v227_v40 }
 0x125   :  { %349 = vmatmul.bf16.vlgmr.msra.gmra.mxu2 %v252_v42  ;;  %378 = vmatmul.bf16.vlgmr.msrb.gmra.mxu3 %v252_v42 }
 0x126   :  { %v212_v43 = vpop.f32.mrf.mxu1 }
 0x127   :  { %v213_v44 = vadd.f32 %v1009_v36, %v212_v43 }
 0x129   :  { %v229_v47 = vmax.f32 %v213_v44, 0.0 }
 0x12e   :  { %v214_v45 = vpop.f32.mrf.mxu1 }
 0x12f   :  { %v215_v46 = vadd.f32 %v1009_v36, %v214_v45 }
 0x131   :  { %v230_v48 = vmax.f32 %v215_v46, 0.0 }
 0x133   :  { %v253_v49 = vpack.c.bf16 %v230_v48, %v229_v47 }
 0x135   :  { %354 = vmatmul.bf16.gmra.mxu2 %v253_v49  ;;  %383 = vmatmul.bf16.gmra.mxu3 %v253_v49 }
 0x13c   :  { %v217_v51 = vpop.f32.mrf.mxu3 }
 0x13d   :  { %v218_v52 = vadd.f32 %v1009_v36, %v217_v51 }
 0x13f   :  { %v231_v55 = vmax.f32 %v218_v52, 0.0 }
 0x144   :  { %v219_v53 = vpop.f32.mrf.mxu3 }
 0x145   :  { %v220_v54 = vadd.f32 %v1009_v36, %v219_v53 }
 0x147   :  { %v232_v56 = vmax.f32 %v220_v54, 0.0 }
 0x149   :  { %v254_v57 = vpack.c.bf16 %v232_v56, %v231_v55 }
 0x14b   :  { %359 = vmatmul.bf16.gmra.mxu2 %v254_v57  ;;  %388 = vmatmul.bf16.gmra.mxu3 %v254_v57  ;;  %v980_v57 = vld [vmem:[#allocation2 + $0xf8] sm:$0xff] }
 0x14c   :  { %v222_v58 = vpop.f32.mrf.mxu3  ;;  %605 = vmatpush.bf16.msrb.mxu1 %v980_v57 }
 0x14d   :  { %v223_v59 = vadd.f32 %v1009_v36, %v222_v58 }
 0x14f   :  { %v233_v62 = vmax.f32 %v223_v59, 0.0  ;;  %v979_v59 = vld [vmem:[#allocation2 + $0xf0] sm:$0xff] }
 0x150   :  { %606 = vmatpush.bf16.msrb.mxu1 %v979_v59 }
 0x154   :  { %v224_v60 = vpop.f32.mrf.mxu3 }
 0x155   :  { %v225_v61 = vadd.f32 %v1009_v36, %v224_v60 }
 0x157   :  { %v234_v63 = vmax.f32 %v225_v61, 0.0 }
 0x159   :  { %v255_v0 = vpack.c.bf16 %v234_v63, %v233_v62 }
 0x15b   :  { %364 = vmatmul.bf16.gmra.mxu2 %v255_v0  ;;  %393 = vmatmul.bf16.gmra.mxu3 %v255_v0 }
 0x1a8   :  { %v350_v4 = vpop.f32.mrf.mxu2  ;;  %v379_v5 = vpop.f32.mrf.mxu3 }
 0x1a9   :  { %v351_v6 = vadd.f32 %v350_v4, %v1234_v2  ;;  %v380_v7 = vadd.f32 %v379_v5, %v1236_v3  ;;  %v978_v4 = vld [vmem:[#allocation2 + $0xe8] sm:$0xff] }
 0x1aa   :  { %607 = vmatpush.bf16.msrb.mxu1 %v978_v4  ;;  %v983_v4 = vld [vmem:[#allocation2 + $0x110] sm:$0xff] }
 0x1ab   :  { %399 = vst [vmem:[%s1370_s7] sm:$0xff] %v351_v6  ;;  %v423_v8 = vmul.f32 0.5, %v380_v7 }
 0x1ac   :  { %400 = vst [vmem:[%s1370_s7 + $0x8] sm:$0xff] %v380_v7 }
 0x1ad   :  { %v431_v9 = vmul.f32 1.442695, %v423_v8 }
 0x1af   :  { %1013 = vpow2.f32 %v431_v9 }
 0x1b0   :  { %v352_v10 = vpop.f32.mrf.mxu2  ;;  %v381_v11 = vpop.f32.mrf.mxu3 }
 0x1b1   :  { %v353_v12 = vadd.f32 %v352_v10, %v1234_v2  ;;  %v382_v13 = vadd.f32 %v381_v11, %v1236_v3  ;;  %v977_v10 = vld [vmem:[#allocation2 + $0xe0] sm:$0xff] }
 0x1b2   :  { %608 = vmatpush.bf16.msrb.mxu1 %v977_v10 }
 0x1b3   :  { %401 = vst [vmem:[%s1370_s7 + $0x10] sm:$0xff] %v353_v12  ;;  %v424_v14 = vmul.f32 0.5, %v382_v13 }
 0x1b4   :  { %402 = vst [vmem:[%s1370_s7 + $0x18] sm:$0xff] %v382_v13 }
 0x1b5   :  { %v433_v15 = vmul.f32 1.442695, %v424_v14  ;;  %v1014_v18 = vpop.eup %1013 }
 0x1b6   :  { %v447_v24 = vmul.f32 %v1014_v18, %v415_v19 }
 0x1b7   :  { %1015 = vpow2.f32 %v433_v15 }
 0x1b8   :  { %v355_v16 = vpop.f32.mrf.mxu2  ;;  %v384_v17 = vpop.f32.mrf.mxu3  ;;  %v455_v30 = vadd.f32 %v447_v24, %v351_v6  ;;  %v420_v6 = vld [vmem:[%s1364_s1 + $0x28] sm:$0xff] }
 0x1b9   :  { %v356_v20 = vadd.f32 %v355_v16, %v1234_v2  ;;  %v385_v21 = vadd.f32 %v384_v17, %v1236_v3 }
 0x1bb   :  { %403 = vst [vmem:[%s1370_s7 + $0x20] sm:$0xff] %v356_v20  ;;  %v425_v23 = vmul.f32 0.5, %v385_v21 }
 0x1bc   :  { %404 = vst [vmem:[%s1370_s7 + $0x28] sm:$0xff] %v385_v21 }
 0x1bd   :  { %v1016_v25 = vpop.eup %1015  ;;  %v435_v27 = vmul.f32 1.442695, %v425_v23 }
 0x1be   :  { %v448_v26 = vmul.f32 %v1016_v25, %v416_v22 }
 0x1bf   :  { %1017 = vpow2.f32 %v435_v27 }
 0x1c0   :  { %v357_v28 = vpop.f32.mrf.mxu2  ;;  %v386_v29 = vpop.f32.mrf.mxu3  ;;  %v456_v31 = vadd.f32 %v448_v26, %v353_v12 }
 0x1c1   :  { %v358_v32 = vadd.f32 %v357_v28, %v1234_v2  ;;  %v387_v33 = vadd.f32 %v386_v29, %v1236_v3  ;;  %v976_v28 = vld [vmem:[#allocation2 + $0xd8] sm:$0xff]  ;;  %v975_v29 = vld [vmem:[#allocation2 + $0xd0] sm:$0xff] }
 0x1c2   :  { %v468_v34 = vpack.c.bf16 %v456_v31, %v455_v30  ;;  %609 = vmatpush.bf16.msrb.mxu1 %v976_v28  ;;  %v974_v30 = vld [vmem:[#allocation2 + $0xc8] sm:$0xff]  ;;  %v973_v31 = vld [vmem:[#allocation2 + $0xc0] sm:$0xff] }
 0x1c3   :  { %405 = vst [vmem:[%s1370_s7 + $0x30] sm:$0xff] %v358_v32  ;;  %v426_v35 = vmul.f32 0.5, %v387_v33 }
 0x1c4   :  { %406 = vst [vmem:[%s1370_s7 + $0x38] sm:$0xff] %v387_v33  ;;  %876 = vmatmul.msk.bf16.vlgmr.msrb.gmra.mxu0 %vm481_vm1, %v468_v34  ;;  %v1010_v33 = vld [vmem:[%s1366_s3 + $0x2] ss:$0 sm:$0xff] }
 0x1c5   :  { %v437_v36 = vmul.f32 1.442695, %v426_v35  ;;  %v1018_v37 = vpop.eup %1017 }
 0x1c6   :  { %v449_v40 = vmul.f32 %v1018_v37, %v417_v38  ;;  %610 = vmatpush.bf16.msrb.mxu1 %v975_v29 }
 0x1c7   :  { %1019 = vpow2.f32 %v437_v36 }
 0x1c8   :  { %v457_v47 = vadd.f32 %v449_v40, %v356_v20 }
 0x1ca   :  { %611 = vmatpush.bf16.msrb.mxu1 %v974_v30 }
 0x1cd   :  { %v1020_v41 = vpop.eup %1019 }
 0x1ce   :  { %v360_v42 = vpop.f32.mrf.mxu2  ;;  %v389_v43 = vpop.f32.mrf.mxu3  ;;  %v450_v44 = vmul.f32 %v1020_v41, %v418_v39  ;;  %612 = vmatpush.bf16.msrb.mxu1 %v973_v31 }
 0x1cf   :  { %v361_v45 = vadd.f32 %v360_v42, %v1234_v2  ;;  %v390_v46 = vadd.f32 %v389_v43, %v1236_v3 }
 0x1d0   :  { %v458_v48 = vadd.f32 %v450_v44, %v358_v32 }
 0x1d1   :  { %407 = vst [vmem:[%s1370_s7 + $0x40] sm:$0xff] %v361_v45  ;;  %v427_v49 = vmul.f32 0.5, %v390_v46 }
 0x1d2   :  { %408 = vst [vmem:[%s1370_s7 + $0x48] sm:$0xff] %v390_v46  ;;  %v469_v50 = vpack.c.bf16 %v458_v48, %v457_v47  ;;  %v988_v47 = vld [vmem:[#allocation2 + $0x138] sm:$0xff] }
 0x1d3   :  { %v439_v51 = vmul.f32 1.442695, %v427_v49  ;;  %997 = vmatpush.bf16.msrb.mxu2 %v988_v47  ;;  %v987_v49 = vld [vmem:[#allocation2 + $0x130] sm:$0xff]  ;;  %716 = vmatpush.bf16.msra.mxu1 %v988_v47 }
 0x1d4   :  { %877 = vmatmul.msk.bf16.gmra.mxu0 %vm481_vm1, %v469_v50  ;;  %v986_v50 = vld [vmem:[#allocation2 + $0x128] sm:$0xff] }
 0x1d5   :  { %1021 = vpow2.f32 %v439_v51 }
 0x1d6   :  { %v362_v52 = vpop.f32.mrf.mxu2  ;;  %v391_v53 = vpop.f32.mrf.mxu3 }
 0x1d7   :  { %v363_v54 = vadd.f32 %v362_v52, %v1234_v2  ;;  %v392_v55 = vadd.f32 %v391_v53, %v1236_v3  ;;  %998 = vmatpush.bf16.msrb.mxu2 %v987_v49  ;;  %717 = vmatpush.bf16.msra.mxu1 %v987_v49 }
 0x1d9   :  { %409 = vst [vmem:[%s1370_s7 + $0x50] sm:$0xff] %v363_v54  ;;  %v428_v56 = vmul.f32 0.5, %v392_v55 }
 0x1da   :  { %410 = vst [vmem:[%s1370_s7 + $0x58] sm:$0xff] %v392_v55 }
 0x1db   :  { %v441_v58 = vmul.f32 1.442695, %v428_v56  ;;  %v1022_v62 = vpop.eup %1021  ;;  %999 = vmatpush.bf16.msrb.mxu2 %v986_v50  ;;  %718 = vmatpush.bf16.msra.mxu1 %v986_v50 }
 0x1dc   :  { %v451_v7 = vmul.f32 %v1022_v62, %v419_v1  ;;  %v984_v1 = vld [vmem:[#allocation2 + $0x118] sm:$0xff] }
 0x1dd   :  { %1023 = vpow2.f32 %v441_v58 }
 0x1de   :  { %v365_v60 = vpop.f32.mrf.mxu2  ;;  %v394_v61 = vpop.f32.mrf.mxu3  ;;  %v459_v14 = vadd.f32 %v451_v7, %v361_v45 }
 0x1df   :  { %v366_v63 = vadd.f32 %v365_v60, %v1234_v2  ;;  %v395_v0 = vadd.f32 %v394_v61, %v1236_v3 }
 0x1e1   :  { %411 = vst [vmem:[%s1370_s7 + $0x60] sm:$0xff] %v366_v63  ;;  %v429_v5 = vmul.f32 0.5, %v395_v0 }
 0x1e2   :  { %412 = vst [vmem:[%s1370_s7 + $0x68] sm:$0xff] %v395_v0 }
 0x1e3   :  { %v1024_v8 = vpop.eup %1023  ;;  %v443_v11 = vmul.f32 1.442695, %v429_v5  ;;  %v982_v5 = vld [vmem:[#allocation2 + $0x108] sm:$0xff] }
 0x1e4   :  { %v452_v9 = vmul.f32 %v1024_v8, %v420_v6  ;;  %v981_v6 = vld [vmem:[#allocation2 + $0x100] sm:$0xff] }
 0x1e5   :  { %1025 = vpow2.f32 %v443_v11  ;;  %v1011_v8 = vld [vmem:[%s1366_s3 + $0x3] ss:$0 sm:$0xff] }
 0x1e6   :  { %v367_v12 = vpop.f32.mrf.mxu2  ;;  %v396_v13 = vpop.f32.mrf.mxu3  ;;  %v460_v15 = vadd.f32 %v452_v9, %v363_v54  ;;  %v985_v54 = vld [vmem:[#allocation2 + $0x120] sm:$0xff] }
 0x1e7   :  { %v368_v16 = vadd.f32 %v367_v12, %v1234_v2  ;;  %v397_v17 = vadd.f32 %v396_v13, %v1236_v3  ;;  %v421_v2 = vld [vmem:[%s1364_s1 + $0x30] sm:$0xff]  ;;  %v422_v3 = vld [vmem:[%s1364_s1 + $0x38] sm:$0xff]  ;;  %719 = vmatpush.bf16.msra.mxu1 %v985_v54  ;;  %1000 = vmatpush.bf16.msrb.mxu2 %v985_v54 }
 0x1e8   :  { %v470_v18 = vpack.c.bf16 %v460_v15, %v459_v14 }
 0x1e9   :  { %413 = vst [vmem:[%s1370_s7 + $0x70] sm:$0xff] %v368_v16  ;;  %v430_v19 = vmul.f32 0.5, %v397_v17 }
 0x1ea   :  { %414 = vst [vmem:[%s1370_s7 + $0x78] sm:$0xff] %v397_v17  ;;  %878 = vmatmul.msk.bf16.gmra.mxu0 %vm481_vm1, %v470_v18 }
 0x1eb   :  { %v445_v20 = vmul.f32 1.442695, %v430_v19  ;;  %v1026_v21 = vpop.eup %1025  ;;  %720 = vmatpush.bf16.msra.mxu1 %v984_v1  ;;  %1001 = vmatpush.bf16.msrb.mxu2 %v984_v1 }
 0x1ec   :  { %v453_v22 = vmul.f32 %v1026_v21, %v421_v2 }
 0x1ed   :  { %1027 = vpow2.f32 %v445_v20 }
 0x1ee   :  { %v461_v25 = vadd.f32 %v453_v22, %v366_v63 }
 0x1ef   :  { %721 = vmatpush.bf16.msra.mxu1 %v983_v4  ;;  %1002 = vmatpush.bf16.msrb.mxu2 %v983_v4 }
 0x1f3   :  { %v1028_v23 = vpop.eup %1027  ;;  %722 = vmatpush.bf16.msra.mxu1 %v982_v5  ;;  %1003 = vmatpush.bf16.msrb.mxu2 %v982_v5 }
 0x1f4   :  { %v454_v24 = vmul.f32 %v1028_v23, %v422_v3 }
 0x1f6   :  { %v462_v26 = vadd.f32 %v454_v24, %v368_v16 }
 0x1f7   :  { %723 = vmatpush.bf16.msra.mxu1 %v981_v6  ;;  %1004 = vmatpush.bf16.msrb.mxu2 %v981_v6 }
 0x1f8   :  { %v471_v27 = vpack.c.bf16 %v462_v26, %v461_v25 }
 0x1fa   :  { %879 = vmatmul.msk.bf16.gmra.mxu0 %vm481_vm1, %v471_v27 }
 0x241   :  { %v503_v32 = vpop.f32.mrf.mxu0 }
 0x242   :  { %v504_v34 = vadd.f32 %v1010_v33, %v503_v32 }
 0x244   :  { %v523_v37 = vmax.f32 %v504_v34, 0.0  ;;  %v1012_v34 = vld [vmem:[%s1366_s3 + $0x4] ss:$0 sm:$0xff] }
 0x249   :  { %v505_v35 = vpop.f32.mrf.mxu0 }
 0x24a   :  { %v506_v36 = vadd.f32 %v1010_v33, %v505_v35 }
 0x24c   :  { %v524_v38 = vmax.f32 %v506_v36, 0.0 }
 0x24e   :  { %v550_v39 = vpack.c.bf16 %v524_v38, %v523_v37 }
 0x250   :  { %613 = vmatmul.bf16.vlgmr.msrb.gmra.mxu1 %v550_v39 }
 0x251   :  { %v508_v40 = vpop.f32.mrf.mxu0 }
 0x252   :  { %v509_v41 = vadd.f32 %v1010_v33, %v508_v40 }
 0x254   :  { %v525_v44 = vmax.f32 %v509_v41, 0.0 }
 0x259   :  { %v510_v42 = vpop.f32.mrf.mxu0 }
 0x25a   :  { %v511_v43 = vadd.f32 %v1010_v33, %v510_v42 }
 0x25c   :  { %v526_v45 = vmax.f32 %v511_v43, 0.0 }
 0x25e   :  { %v551_v46 = vpack.c.bf16 %v526_v45, %v525_v44 }
 0x260   :  { %618 = vmatmul.bf16.gmra.mxu1 %v551_v46 }
 0x267   :  { %v513_v48 = vpop.f32.mrf.mxu0 }
 0x268   :  { %v514_v51 = vadd.f32 %v1010_v33, %v513_v48 }
 0x26a   :  { %v527_v55 = vmax.f32 %v514_v51, 0.0 }
 0x26f   :  { %v515_v52 = vpop.f32.mrf.mxu0 }
 0x270   :  { %v516_v53 = vadd.f32 %v1010_v33, %v515_v52 }
 0x272   :  { %v528_v56 = vmax.f32 %v516_v53, 0.0 }
 0x274   :  { %v552_v57 = vpack.c.bf16 %v528_v56, %v527_v55 }
 0x276   :  { %623 = vmatmul.bf16.gmra.mxu1 %v552_v57 }
 0x277   :  { %v518_v58 = vpop.f32.mrf.mxu0 }
 0x278   :  { %v519_v59 = vadd.f32 %v1010_v33, %v518_v58 }
 0x27a   :  { %v529_v62 = vmax.f32 %v519_v59, 0.0 }
 0x27f   :  { %v520_v60 = vpop.f32.mrf.mxu0 }
 0x280   :  { %v521_v61 = vadd.f32 %v1010_v33, %v520_v60 }
 0x282   :  { %v530_v63 = vmax.f32 %v521_v61, 0.0 }
 0x284   :  { %v553_v0 = vpack.c.bf16 %v530_v63, %v529_v62 }
 0x286   :  { %628 = vmatmul.bf16.gmra.mxu1 %v553_v0 }
 0x2cd   :  { %v614_v7 = vpop.f32.mrf.mxu1 }
 0x2ce   :  { %v615_v9 = vadd.f32 %v1011_v8, %v614_v7 }
 0x2d0   :  { %v634_v12 = vmax.f32 %v615_v9, 0.0 }
 0x2d5   :  { %v616_v10 = vpop.f32.mrf.mxu1 }
 0x2d6   :  { %v617_v11 = vadd.f32 %v1011_v8, %v616_v10 }
 0x2d8   :  { %v635_v13 = vmax.f32 %v617_v11, 0.0 }
 0x2da   :  { %v661_v14 = vpack.c.bf16 %v635_v13, %v634_v12 }
 0x2dc   :  { %724 = vmatmul.bf16.vlgmr.msra.gmra.mxu1 %v661_v14 }
 0x2dd   :  { %v619_v15 = vpop.f32.mrf.mxu1 }
 0x2de   :  { %v620_v16 = vadd.f32 %v1011_v8, %v619_v15 }
 0x2e0   :  { %v636_v19 = vmax.f32 %v620_v16, 0.0 }
 0x2e5   :  { %v621_v17 = vpop.f32.mrf.mxu1 }
 0x2e6   :  { %v622_v18 = vadd.f32 %v1011_v8, %v621_v17 }
 0x2e8   :  { %v637_v20 = vmax.f32 %v622_v18, 0.0 }
 0x2ea   :  { %v662_v21 = vpack.c.bf16 %v637_v20, %v636_v19 }
 0x2ec   :  { %729 = vmatmul.bf16.vlgmr.msrb.gmra.mxu2 %v662_v21 }
 0x2f3   :  { %v624_v2 = vpop.f32.mrf.mxu1 }
 0x2f4   :  { %v625_v3 = vadd.f32 %v1011_v8, %v624_v2 }
 0x2f6   :  { %v638_v24 = vmax.f32 %v625_v3, 0.0 }
 0x2fb   :  { %v626_v22 = vpop.f32.mrf.mxu1 }
 0x2fc   :  { %v627_v23 = vadd.f32 %v1011_v8, %v626_v22 }
 0x2fe   :  { %v639_v25 = vmax.f32 %v627_v23, 0.0 }
 0x300   :  { %v663_v26 = vpack.c.bf16 %v639_v25, %v638_v24 }
 0x302   :  { %734 = vmatmul.bf16.gmra.mxu2 %v663_v26 }
 0x303   :  { %v629_v27 = vpop.f32.mrf.mxu1 }
 0x304   :  { %v630_v28 = vadd.f32 %v1011_v8, %v629_v27 }
 0x306   :  { %v640_v31 = vmax.f32 %v630_v28, 0.0 }
 0x30b   :  { %v631_v29 = vpop.f32.mrf.mxu1 }
 0x30c   :  { %v632_v30 = vadd.f32 %v1011_v8, %v631_v29 }
 0x30e   :  { %v641_v32 = vmax.f32 %v632_v30, 0.0 }
 0x310   :  { %v664_v33 = vpack.c.bf16 %v641_v32, %v640_v31 }
 0x312   :  { %739 = vmatmul.bf16.gmra.mxu2 %v664_v33 }
 0x359   :  { %v725_v35 = vpop.f32.mrf.mxu1 }
 0x35a   :  { %v726_v36 = vadd.f32 %v1012_v34, %v725_v35 }
 0x35c   :  { %745 = vst [vmem:[%s1369_s6] sm:$0xff] %v726_v36 }
 0x361   :  { %v727_v37 = vpop.f32.mrf.mxu1 }
 0x362   :  { %v728_v38 = vadd.f32 %v1012_v34, %v727_v37 }
 0x364   :  { %746 = vst [vmem:[%s1369_s6 + $0x8] sm:$0xff] %v728_v38 }
 0x36f   :  { %v730_v39 = vpop.f32.mrf.mxu2 }
 0x370   :  { %v731_v40 = vadd.f32 %v1012_v34, %v730_v39 }
 0x372   :  { %747 = vst [vmem:[%s1369_s6 + $0x10] sm:$0xff] %v731_v40 }
 0x377   :  { %v732_v41 = vpop.f32.mrf.mxu2 }
 0x378   :  { %v733_v42 = vadd.f32 %v1012_v34, %v732_v41 }
 0x37a   :  { %748 = vst [vmem:[%s1369_s6 + $0x18] sm:$0xff] %v733_v42 }
 0x385   :  { %v735_v43 = vpop.f32.mrf.mxu2 }
 0x386   :  { %v736_v44 = vadd.f32 %v1012_v34, %v735_v43 }
 0x388   :  { %749 = vst [vmem:[%s1369_s6 + $0x20] sm:$0xff] %v736_v44 }
 0x38d   :  { %v737_v45 = vpop.f32.mrf.mxu2 }
 0x38e   :  { %v738_v46 = vadd.f32 %v1012_v34, %v737_v45 }
 0x390   :  { %750 = vst [vmem:[%s1369_s6 + $0x28] sm:$0xff] %v738_v46 }
 0x395   :  { %v740_v47 = vpop.f32.mrf.mxu2 }
 0x396   :  { %v741_v48 = vadd.f32 %v1012_v34, %v740_v47 }
 0x398   :  { %751 = vst [vmem:[%s1369_s6 + $0x30] sm:$0xff] %v741_v48 }
 0x39d   :  { %v742_v49 = vpop.f32.mrf.mxu2 }
 0x39e   :  { %v743_v50 = vadd.f32 %v1012_v34, %v742_v49 }
 0x3a0   :  { %752 = vst [vmem:[%s1369_s6 + $0x38] sm:$0xff] %v743_v50 }
 0x3a1   :  { %761 = vsyncpa [#allocation3], 1 }

</bundles_post_ra>
